<compile_context>
chip_gen: v6e
topology: v6e:2x2x1
jax: 0.10.0
libtpu: 0.0.40
codegen_flags: <defaults>
</compile_context>

<pallas_src>
import numpy as np
import jax
import jax.numpy as jnp
from jax.experimental import pallas as pl
from jax.experimental.pallas import tpu as pltpu

SIZES = (1, 2, 3, 6)


def _round_up(x: int, m: int) -> int:
    return ((x + m - 1) // m) * m


# ----------------------------------------------------------------------------
# Static pooling / interpolation matrices (numpy -> trace-time constants).
# ----------------------------------------------------------------------------
def adaptive_pool_matrix(in_size: int, out_size: int) -> np.ndarray:
    """Row-stochastic P (out_size, in_size) s.t. P @ x == AdaptiveAvgPool1d(x)."""
    m = np.zeros((out_size, in_size), dtype=np.float32)
    for i in range(out_size):
        start = (i * in_size) // out_size
        end = -(-((i + 1) * in_size) // out_size)  # ceil
        m[i, start:end] = 1.0 / (end - start)
    return m


def bilinear_matrix(out_size: int, in_size: int) -> np.ndarray:
    """U (out_size, in_size) for 1-D bilinear interpolation, align_corners=True
    (matches F.upsample(..., mode='bilinear', align_corners=True) in the spec)."""
    m = np.zeros((out_size, in_size), dtype=np.float32)
    if in_size == 1 or out_size == 1:
        m[:, 0] = 1.0
        return m
    scale = (in_size - 1) / (out_size - 1)
    for y in range(out_size):
        src = y * scale
        i0 = min(int(np.floor(src)), in_size - 1)
        i1 = min(i0 + 1, in_size - 1)
        w = src - i0
        m[y, i0] += 1.0 - w
        m[y, i1] += w
    return m


def _coeff_transposed(H: int, W: int) -> np.ndarray:
    """(K, H*W) bilinear-upsample coefficients for all stages, K = sum(s^2)=50."""
    blocks = []
    for s in SIZES:
        Uh = bilinear_matrix(H, s)                                   # (H, s)
        Uw = bilinear_matrix(W, s)                                   # (W, s)
        blocks.append(np.einsum('yi,xj->ijyx', Uh, Uw).reshape(s * s, H * W))
    return np.concatenate(blocks, axis=0)


def _stacked_pool_matrices(H: int, W: int):
    Ph = np.concatenate([adaptive_pool_matrix(H, s) for s in SIZES], axis=0)  # (12, H)
    Pw = np.concatenate([adaptive_pool_matrix(W, s) for s in SIZES], axis=0)  # (12, W)
    return Ph, Pw


# ----------------------------------------------------------------------------
# Glue: per-batch "tiny" stage maps (single pooling pass over feats).
# ----------------------------------------------------------------------------
def _prepare_tinyT(feats_nchw, stage_weights, w_bn):
    """tiny^T: (N, F, K) = transpose of (pooled @ W_stage @ W_bottleneck_slice)."""
    N, C, H, W = feats_nchw.shape
    Ph, Pw = _stacked_pool_matrices(H, W)
    # ONE pass over feats for all four adaptive poolings (NCHW, no transpose).
    pooled = jnp.einsum('iy,ncyx,jx->nijc',
                        jnp.asarray(Ph), feats_nchw.astype(jnp.float32),
                        jnp.asarray(Pw))                              # (N, 12, 12, C)
    tiny_blocks = []
    off = 0
    for k, s in enumerate(SIZES):
        blk = pooled[:, off:off + s, off:off + s, :].reshape(N, s * s, C)
        # fold stage 1x1 conv into the matching bottleneck-weight slice
        wk = stage_weights[k].astype(jnp.float32) @ w_bn[k].astype(jnp.float32)  # (C, F)
        tiny_blocks.append(blk @ wk)                                  # (N, s*s, F)
        off += s
    tiny = jnp.concatenate(tiny_blocks, axis=1)                       # (N, K, F)
    return jnp.transpose(tiny, (0, 2, 1))                             # (N, F, K)


# ----------------------------------------------------------------------------
# Pallas kernel + wrapper.
# ----------------------------------------------------------------------------
def _choose_tiling(HW: int, target: int):
    """Pick tm (lane-dim tile) that divides HW when possible -> no feats padding."""
    target = max(128, (int(target) // 128) * 128)
    if HW <= target:
        return HW, HW                       # single full-width block (legal: full dim)
    t = target
    while t >= 128:
        if HW % t == 0:
            return t, HW
        t -= 128
    return target, _round_up(HW, target)    # fallback: pad HW


def psp_module_forward(feats_nchw, stage_weights, w_bn, b_bn, *,
                       compute_dtype=jnp.bfloat16, out_dtype=None, tm=1024):
    N, C, H, W = feats_nchw.shape
    F = w_bn.shape[-1]
    HW = H * W
    if out_dtype is None:
        out_dtype = feats_nchw.dtype

    # --- small trace-time operands -------------------------------------------
    tinyT = _prepare_tinyT(feats_nchw, stage_weights, w_bn)           # (N, F, K)
    coeffT = jnp.asarray(_coeff_transposed(H, W))                     # (K, HW)
    K = coeffT.shape[0]

    KP = _round_up(K, 64)            # 50 -> 64 (full-dim block, much tighter than 128)
    FP = _round_up(F, 8)             # F is the sublane dim; tm (lanes) stays 128-dense

    tm, HW_pad = _choose_tiling(HW, tm)

    # --- VMEM budget (v7x-safe cap, shrink tm rather than silently clamping) --
    feat_isz = max(jnp.dtype(feats_nchw.dtype).itemsize,
                   jnp.dtype(compute_dtype).itemsize)
    c_isz = jnp.dtype(compute_dtype).itemsize
    o_isz = jnp.dtype(out_dtype).itemsize

    def vmem_needed(t):
        return (2 * t * C * feat_isz          # feats tile (double-buffered)
                + 2 * KP * t * c_isz          # coeff^T tile
                + 2 * FP * KP * c_isz         # tiny^T
                + 2 * FP * C * c_isz          # W_feat^T (resident)
                + 2 * FP * 4                  # bias
                + 2 * FP * t * o_isz)         # output tile

    try:
        cap = int(getattr(pltpu.get_tpu_info(), "vmem_capacity_bytes", 64 << 20))
    except Exception:  # pragma: no cover - conservative fallback
        cap = 64 << 20
    budget = max(24 << 20, cap - (16 << 20))
    while vmem_needed(tm) > budget and tm > 128:
        tm, HW_pad = _choose_tiling(HW, max(128, tm // 2))
    vmem_limit = int(min(max(2 * vmem_needed(tm), vmem_needed(tm) + (2 << 20),
                             24 << 20), budget))

    # --- operand padding / casts (feats stays in native dtype, cast on-chip) --
    feats_flat = feats_nchw.reshape(N, C, HW)
    if HW_pad != HW:
        feats_flat = jnp.pad(feats_flat.astype(compute_dtype),
                             ((0, 0), (0, 0), (0, HW_pad - HW)))
    coeffT_p = jnp.pad(coeffT, ((0, KP - K), (0, HW_pad - HW))).astype(compute_dtype)
    tinyT_p = jnp.pad(tinyT, ((0, 0), (0, FP - F), (0, KP - K))).astype(compute_dtype)
    w_featT = jnp.pad(jnp.transpose(w_bn[len(SIZES)].astype(jnp.float32)),
                      ((0, FP - F), (0, 0))).astype(compute_dtype)    # (FP, C)
    bias = jnp.pad(jnp.reshape(b_bn, (F, 1)).astype(jnp.float32),
                   ((0, FP - F), (0, 0)))                             # (FP, 1) f32

    grid = (HW_pad // tm, N)   # row tiles outer, batch inner -> coeff^T fetched once/tile

    def kernel(f_ref, c_ref, t_ref, w_ref, b_ref, o_ref):
        # f_ref: (1, C, tm)   feats columns, native dtype  (cast on-chip)
        # c_ref: (KP, tm)     bilinear coefficients^T      (compute dtype)
        # t_ref: (1, FP, KP)  per-batch stage maps^T       (compute dtype)
        # w_ref: (FP, C)      bottleneck weight^T, feats slice
        # b_ref: (FP, 1)      bias (f32)
        # o_ref: (1, FP, tm)  output (out_dtype)
        feats = f_ref[0].astype(compute_dtype)
        acc = jnp.dot(w_ref[...], feats, preferred_element_type=jnp.float32)
        acc = acc + jnp.dot(t_ref[0], c_ref[...], preferred_element_type=jnp.float32)
        acc = acc + b_ref[...]
        o_ref[0] = jnp.maximum(acc, 0.0).astype(o_ref.dtype)

    out = pl.pallas_call(
        kernel,
        out_shape=jax.ShapeDtypeStruct((N, FP, HW_pad), out_dtype),
        grid=grid,
        in_specs=[
            pl.BlockSpec((1, C, tm), lambda i, n: (n, 0, i)),    # feats columns
            pl.BlockSpec((KP, tm), lambda i, n: (0, i)),         # coeff^T (const over n)
            pl.BlockSpec((1, FP, KP), lambda i, n: (n, 0, 0)),   # tiny^T (small)
            pl.BlockSpec((FP, C), lambda i, n: (0, 0)),          # W_feat^T (resident)
            pl.BlockSpec((FP, 1), lambda i, n: (0, 0)),          # bias (resident)
        ],
        out_specs=pl.BlockSpec((1, FP, tm), lambda i, n: (n, 0, i)),
        compiler_params=pltpu.CompilerParams(
            dimension_semantics=("parallel", "parallel"),
            vmem_limit_bytes=vmem_limit),
    )(feats_flat, coeffT_p, tinyT_p, w_featT, bias)

    out = out[:, :F, :HW].reshape(N, F, H, W)   # no-op when F%8==0 and tm | HW
    return out.astype(out_dtype)


# ----------------------------------------------------------------------------
# Pure-jnp reference: direct port of the PyTorch module (concat + 1x1 conv + ReLU).
# ----------------------------------------------------------------------------
def psp_module_reference(feats_nchw, stage_weights, w_bn, b_bn):
    N, C, H, W = feats_nchw.shape
    x = jnp.transpose(feats_nchw, (0, 2, 3, 1)).astype(jnp.float32)  # NHWC
    priors = []
    for s, ws in zip(SIZES, stage_weights):
        Ph = jnp.asarray(adaptive_pool_matrix(H, s))
        Pw = jnp.asarray(adaptive_pool_matrix(W, s))
        pooled = jnp.einsum('iy,nyxc,jx->nijc', Ph, x, Pw)
        conved = pooled @ ws
        Uh = jnp.asarray(bilinear_matrix(H, s))
        Uw = jnp.asarray(bilinear_matrix(W, s))
        priors.append(jnp.einsum('yi,nijc,xj->nyxc', Uh, conved, Uw))
    cat = jnp.concatenate(priors + [x], axis=-1)                     # torch.cat order
    F_out = w_bn.shape[-1]
    out = jnp.maximum(cat @ w_bn.reshape(-1, F_out) + jnp.reshape(b_bn, (1, F_out)), 0.0)
    return jnp.transpose(out, (0, 3, 1, 2))


if __name__ == "__main__":
    # Small shapes consistent with the module: features=C=4, out_features=32.
    N, C, H, W = 2, 4, 16, 16
    OUT_F = 32

    key = jax.random.PRNGKey(0)
    keys = jax.random.split(key, 7)

    # stage conv weights: (C_in, C_out) == transpose of torch Conv2d weight[:, :, 0, 0]
    stage_weights = [0.1 * jax.random.normal(keys[i], (C, C), jnp.float32)
                     for i in range(4)]
    # bottleneck weight laid out as (5, C, OUT_F); flattening the first two dims
    # gives the (in_ch=5C, out_ch) transpose of the torch 1x1 conv weight.
    w_bn = 0.05 * jax.random.normal(keys[4], (5, C, OUT_F), jnp.float32)
    b_bn = 0.05 * jax.random.normal(keys[5], (1, OUT_F), jnp.float32)
    feats = jax.random.normal(keys[6], (N, C, H, W), jnp.float32)

    ref = np.asarray(psp_module_reference(feats, stage_weights, w_bn, b_bn))

    # f32 path: validates the kernel math (upsample/conv commutation, NCHW layout).
    out_f32 = psp_module_forward(feats, stage_weights, w_bn, b_bn,
                                 compute_dtype=jnp.float32, out_dtype=jnp.float32)
    out_f32 = jax.block_until_ready(out_f32)
    assert out_f32.shape == (N, OUT_F, H, W), out_f32.shape
    np.testing.assert_allclose(np.asarray(out_f32), ref, rtol=1e-4, atol=1e-4)

    # bf16 path: the performance configuration (bf16 streams, f32 acc, bf16 out).
    out_bf16 = psp_module_forward(feats, stage_weights, w_bn, b_bn,
                                  compute_dtype=jnp.bfloat16, out_dtype=jnp.bfloat16)
    out_bf16 = jax.block_until_ready(out_bf16)
    assert out_bf16.shape == (N, OUT_F, H, W), out_bf16.shape
    np.testing.assert_allclose(np.asarray(out_bf16, dtype=np.float32), ref,
                               rtol=3e-2, atol=3e-2)

    print("KERNEL_OK")
</pallas_src>

<mosaic_0001>
module attributes {stable_mosaic.version = 11 : i64} {
  func.func @kernel(%arg0: i32, %arg1: i32, %arg2: memref<1x4x256xf32, #tpu.memory_space<vmem>>, %arg3: memref<64x256xf32, #tpu.memory_space<vmem>>, %arg4: memref<1x32x64xf32, #tpu.memory_space<vmem>>, %arg5: memref<32x4xf32, #tpu.memory_space<vmem>>, %arg6: memref<32x1xf32, #tpu.memory_space<vmem>>, %arg7: memref<1x32x256xf32, #tpu.memory_space<vmem>>) attributes {dimension_semantics = [#tpu.dimension_semantics<parallel>, #tpu.dimension_semantics<parallel>], iteration_bounds = array<i64: 1, 2>, scalar_prefetch = 0 : i64, scratch_operands = 0 : i64, tpu.core_type = #tpu.core_type<tc>, window_params = [{transform_indices = @transform_0, window_bounds = array<i64: 1, 4, 256>}, {transform_indices = @transform_1, window_bounds = array<i64: 64, 256>}, {transform_indices = @transform_2, window_bounds = array<i64: 1, 32, 64>}, {pipeline_mode = #tpu.pipeline_mode<synchronous>, transform_indices = @transform_3, window_bounds = array<i64: 32, 4>}, {pipeline_mode = #tpu.pipeline_mode<synchronous>, transform_indices = @transform_4, window_bounds = array<i64: 32, 1>}, {transform_indices = @transform_5, window_bounds = array<i64: 1, 32, 256>}]} {
    %c0 = arith.constant 0 : index
    %c0_0 = arith.constant 0 : index
    %c0_1 = arith.constant 0 : index
    %0 = vector.load %arg2[%c0, %c0_0, %c0_1] : memref<1x4x256xf32, #tpu.memory_space<vmem>>, vector<1x4x256xf32>
    %1 = vector.shape_cast %0 : vector<1x4x256xf32> to vector<4x256xf32>
    %c0_2 = arith.constant 0 : index
    %c0_3 = arith.constant 0 : index
    %2 = vector.load %arg5[%c0_2, %c0_3] : memref<32x4xf32, #tpu.memory_space<vmem>>, vector<32x4xf32>
    %cst = arith.constant dense<0.000000e+00> : vector<32x256xf32>
    %3 = tpu.matmul %2, %1, %cst {dimension_numbers = #tpu.dot_dimension_numbers<[1], [0], [0], [1], [0, 0, 1, 1], [], []>} : vector<32x4xf32>, vector<4x256xf32>, vector<32x256xf32> -> vector<32x256xf32>
    %c0_4 = arith.constant 0 : index
    %c0_5 = arith.constant 0 : index
    %c0_6 = arith.constant 0 : index
    %4 = vector.load %arg4[%c0_4, %c0_5, %c0_6] : memref<1x32x64xf32, #tpu.memory_space<vmem>>, vector<1x32x64xf32>
    %5 = vector.shape_cast %4 : vector<1x32x64xf32> to vector<32x64xf32>
    %c0_7 = arith.constant 0 : index
    %c0_8 = arith.constant 0 : index
    %6 = vector.load %arg3[%c0_7, %c0_8] : memref<64x256xf32, #tpu.memory_space<vmem>>, vector<64x256xf32>
    %cst_9 = arith.constant dense<0.000000e+00> : vector<32x256xf32>
    %7 = tpu.matmul %5, %6, %cst_9 {dimension_numbers = #tpu.dot_dimension_numbers<[1], [0], [0], [1], [0, 0, 1, 1], [], []>} : vector<32x64xf32>, vector<64x256xf32>, vector<32x256xf32> -> vector<32x256xf32>
    %8 = arith.addf %3, %7 : vector<32x256xf32>
    %c0_10 = arith.constant 0 : index
    %c0_11 = arith.constant 0 : index
    %9 = vector.load %arg6[%c0_10, %c0_11] : memref<32x1xf32, #tpu.memory_space<vmem>>, vector<32x1xf32>
    %10 = vector.broadcast %9 : vector<32x1xf32> to vector<32x256xf32>
    %11 = arith.addf %8, %10 : vector<32x256xf32>
    %cst_12 = arith.constant 0.000000e+00 : f32
    %12 = vector.broadcast %cst_12 : f32 to vector<32x256xf32>
    %13 = arith.maximumf %11, %12 : vector<32x256xf32>
    %c0_13 = arith.constant 0 : index
    %c0_14 = arith.constant 0 : index
    %c0_15 = arith.constant 0 : index
    %14 = vector.load %arg7[%c0_13, %c0_14, %c0_15] : memref<1x32x256xf32, #tpu.memory_space<vmem>>, vector<1x32x256xf32>
    %15 = vector.shape_cast %14 : vector<1x32x256xf32> to vector<32x256xf32>
    %16 = vector.shape_cast %13 : vector<32x256xf32> to vector<1x32x256xf32>
    tpu.vector_store %arg7[%c0_13, %c0_14, %c0_15], %16 {strides = array<i32>} : memref<1x32x256xf32, #tpu.memory_space<vmem>>, vector<1x32x256xf32>,
    return
  }
  func.func @transform_0(%arg0: i32, %arg1: i32) -> (i32, i32, i32) {
    %c0_i32 = arith.constant 0 : i32
    %c0_i32_0 = arith.constant 0 : i32
    return %arg1, %c0_i32, %arg0 : i32, i32, i32
  }
  func.func @transform_1(%arg0: i32, %arg1: i32) -> (i32, i32) {
    %c0_i32 = arith.constant 0 : i32
    %c0_i32_0 = arith.constant 0 : i32
    return %c0_i32, %arg0 : i32, i32
  }
  func.func @transform_2(%arg0: i32, %arg1: i32) -> (i32, i32, i32) {
    %c0_i32 = arith.constant 0 : i32
    %c0_i32_0 = arith.constant 0 : i32
    %c0_i32_1 = arith.constant 0 : i32
    return %arg1, %c0_i32, %c0_i32_0 : i32, i32, i32
  }
  func.func @transform_3(%arg0: i32, %arg1: i32) -> (i32, i32) {
    %c0_i32 = arith.constant 0 : i32
    %c0_i32_0 = arith.constant 0 : i32
    %c0_i32_1 = arith.constant 0 : i32
    return %c0_i32, %c0_i32_0 : i32, i32
  }
  func.func @transform_4(%arg0: i32, %arg1: i32) -> (i32, i32) {
    %c0_i32 = arith.constant 0 : i32
    %c0_i32_0 = arith.constant 0 : i32
    %c0_i32_1 = arith.constant 0 : i32
    return %c0_i32, %c0_i32_0 : i32, i32
  }
  func.func @transform_5(%arg0: i32, %arg1: i32) -> (i32, i32, i32) {
    %c0_i32 = arith.constant 0 : i32
    %c0_i32_0 = arith.constant 0 : i32
    return %arg1, %c0_i32, %arg0 : i32, i32, i32
  }
}

</mosaic_0001>

<bundles_post_ra>
// kernel: tpu_custom_call.1
= control target key start
LH: loop header
LB: loop body
LE: loop exit
PB: predicated region body
PF: predicated region fallthrough
CT: control target
= control target key end

     0   :  { %s1253_s0 = inlined_call_operand.hbm [shape: f32[2,4,256], index: 0, kind: input, shape index: {}]   ;;  %s1254_s1 = inlined_call_operand.hbm [shape: f32[64,256], index: 1, kind: input, shape index: {}]   ;;  %s1255_s2 = inlined_call_operand.vmem [shape: f32[2,32,64], index: 2, kind: input, shape index: {}]   ;;  %s1256_s3 = inlined_call_operand.vmem [shape: f32[32,4], index: 3, kind: input, shape index: {}]   ;;  %s1257_s4 = inlined_call_operand.vmem [shape: f32[32,1], index: 4, kind: input, shape index: {}]   ;;  %s1258_s5 = inlined_call_operand.hbm [shape: f32[2,32,256], index: 5, kind: output, shape index: {}]  }
   0x1   :  { %1261 = sst [smem:[#allocation12_spill]] %s1254_s1 }
   0x2   :  { %10 = vsyncpa [#allocation3], 0 }
   0x3   :  { %12 = vsyncpa [#allocation3 + $0x1], 0 }
   0x4   :  { %13 = vsyncpa [#allocation6], 0 }
   0x5   :  { %14 = vsyncpa [#allocation4], 0 }
   0x6   :  { %16 = vsyncpa [#allocation4 + $0x1], 0  ;;  %s1009_s18 = smov 0   ;;  %s1011_s19 = smov 0  }
   0x7   :  { %s1013_s20 = smov 0   ;;  %s1015_s21 = smov 0  }
   0x8   :  { %s1017_s22 = smov 0   ;;  %s1019_s23 = smov 0  }
   0x9 LB: > { %s716_s24 = sadd.s32 4294967295, %s968_s23   ;;  %s717_s25 = sadd.s32 4294967294, %s968_s23   ;;  %s968_s23 = sphi %s1019_s23, %s22_s23   ;;  %s964_s22 = sphi %s1017_s22, %s1281_s22   ;;  %s960_s21 = sphi %s1015_s21, %s1280_s21   ;;  %s956_s20 = sphi %s1013_s20, %s1279_s20   ;;  %s952_s19 = sphi %s1011_s19, %s1278_s19   ;;  %s948_s18 = sphi %s1009_s18, %s1277_s18  }
   0xa   : > { %p56_p0 = scmp.ne.s32.totalorder %s952_s19, %s948_s18  ;;  %p1043_p1 = scmp.eq.s32.totalorder %s716_s24, 0 }
   0xb   : > { %p1047_p2 = scmp.eq.s32.totalorder %s716_s24, 1  ;;  %p182_p3 = scmp.eq.s32.totalorder %s717_s25, 1 }
   0xc   : > { %p1053_p4 = por %p1043_p1, %p56_p0  ;;  %p718_p5 = scmp.ge.s32.totalorder %s968_s23, 1 }
   0xd   : > { %p1058_p6 = por %p182_p3, %p56_p0  ;;  %p189_p7 = scmp.lt.s32.totalorder %s968_s23, 3 }
   0xe   : > { %s1264_s28 = scalar_select %p1053_p4, 1, 0 }
   0xf   : > { %s1265_s29 = scalar_select %p1058_p6, 1, 0 }
  0x10   : > { %p1063_p8 = pnand %p718_p5, %p189_p7  ;;  %s970_s6 = smov [#allocation5]  }
  0x11   : > { %s204_s7 = sshll.u32 %s970_s6, 4  ;;  %s31_s9 = sadd.s32 1, %s964_s22  ;;  %s205_s7 = int_to_ptr.vmem [resolvable:$true] %s204_s7 }
  0x12   : > { %p756_p9 = pneg %p1063_p8  ;;  %s841_s10 = scalar_lea.vmem %s205_s7, 2048 }
  0x13   : > { %p842_p13 = scmp.ne.s32.totalorder %s205_s7, %s841_s10  ;;  %p849_p5 = scmp.lt.s32.totalorder %s205_s7, %s205_s7 }
  0x14   : > { %p1072_p11 = pnand %p756_p9, %p1043_p1  ;;  %p850_p7 = scmp.lt.s32.totalorder %s841_s10, %s841_s10 }
  0x16   : > { %p832_p12 = pneg %p1072_p11  ;;  %p851_p6 = por %p850_p7, %p849_p5 }
  0x18   : > { %p844_p0 = pnand %p842_p13, %p832_p12 }
  0x1a   : > { %p845_p3 = pneg %p844_p0 }
  0x1c   : > { %p852_p4 = pnand %p851_p6, %p845_p3 }
  0x1e   : > { %855 = shalt.err (!%p852_p4)
}
  0x1f   : > { %s971_s11 = smov 256   ;;  %s972_s12 = smov 16  }
  0x20   : > { %s1268_s1 = sld [smem:[#allocation12_spill]]  ;;  %p32_p6 = scmp.ge.s32.totalorder %s31_s9, 2 }
  0x21   : > { %s43_s15 = sadd.s32 1, %s956_s20  ;;  %p50_p4 = scmp.ne.s32.totalorder %s956_s20, %s952_s19 }
  0x22   : > { %p51_p9 = scmp.eq.s32.totalorder %s968_s23, 0  ;;  %s1283_s9 = smov (%p32_p6, %s31_s9), 0 }
  0x23   : > { %1269 = sst [smem:[#allocation11_spill]] %s1283_s9  ;;  %p1096_p13 = por %p1047_p2, %p50_p4 }
  0x24   : > { %p1090_p12 = por %p51_p9, %p50_p4  ;;  %s38_s24 = ssub.s32 %s964_s22, %s1283_s9 }
  0x25   : > { %p769_p0 = scmp.lt.s32.totalorder %s968_s23, 2  ;;  %s224_s25 = sand.u32 1, %s956_s20  }
  0x26   : > { %759 = dma.hbm_to_vmem [thread:$0]  (!%p1072_p11), %s1268_s1, 2048, %s205_s7, [#allocation6], %s971_s11, %s971_s11, %s972_s12  }
  0x27   : > { %p41_p11 = scmp.eq.s32.totalorder %s38_s24, 0  ;;  %s721_s6 = sshll.u32 %s224_s25, 3 }
  0x28   : > { %s745_s8 = sshll.u32 %s964_s22, 7  ;;  %s228_s13 = scalar_lea.vmem [#allocation2], %s721_s6 }
  0x29   : > { %s1105_s7 = scalar_select %p41_p11, %s956_s20, %s43_s15  }
  0x2a   : > { %s236_s12 = scalar_lea.hbm %s1253_s0, %s745_s8  ;;  %s238_s14 = sshll.u32 %s228_s13, 4  ;;  %s239_s14 = int_to_ptr.vmem [resolvable:$true] %s238_s14 }
  0x2b   : > { %p1113_p2 = pnand %p769_p0, %p1090_p12  ;;  %s225_s1 = scalar_lea.sflag [#allocation3], %s224_s25 }
  0x2c   : > { %s869_s24 = scalar_lea.vmem %s239_s14, 128  ;;  %s973_s15 = smov [#allocation2]  }
  0x2d   : > { %p858_p3 = pneg %p1113_p2  ;;  %p870_p5 = scmp.ne.s32.totalorder %s239_s14, %s869_s24 }
  0x2e   : > { %s874_s9 = sshll.u32 %s973_s15, 4  ;;  %s875_s9 = int_to_ptr.vmem [resolvable:$false] %s874_s9 }
  0x2f   : > { %p872_p7 = pnand %p870_p5, %p858_p3  ;;  %s876_s8 = scalar_lea.vmem %s875_s9, 256 }
  0x30   : > { %p877_p4 = scmp.lt.s32.totalorder %s239_s14, %s875_s9  ;;  %p878_p9 = scmp.lt.s32.totalorder %s876_s8, %s869_s24 }
  0x31   : > { %p873_p6 = pneg %p872_p7 }
  0x32   : > { %p879_p11 = por %p878_p9, %p877_p4 }
  0x34   : > { %p880_p10 = pnand %p879_p11, %p873_p6 }
  0x36   : > { %883 = shalt.err (!%p880_p10)
}
  0x37   : > { %763 = dma.hbm_to_vmem [thread:$0]  (!%p1113_p2), %s236_s12, 128, %s239_s14, %s225_s1  }
  0x38   : > { %255 = sbr.rel (%p1063_p8) target bundleno = 310 (0x136), region = 40  ;;  %s1124_s16 = sand.u32 (!%p1063_p8), 1, %s952_s19  }
  0x39   : > { %s725_s25 = sshll.u32 (!%p1063_p8), %s1124_s16, 3  ;;  %s258_s6 = scalar_lea.sflag (!%p1063_p8), [#allocation3], %s1124_s16 }
  0x3a   : > { %s261_s10 = scalar_lea.vmem (!%p1063_p8), [#allocation2], %s725_s25  ;;  %p1273_p12 = scmp.ne.s32.totalorder (!%p1063_p8), %s1264_s28, 0 }
  0x3d   : > { %935 = dma.done.wait (%p1273_p12), %s258_s6, 128  }
  0x3e   : > { %937 = vsyncadd (%p1273_p12), %s258_s6, 4294967168 }
  0x3f   : > { %939 = dma.done.wait (%p1043_p1), [#allocation6], 2048  }
  0x40   : > { %941 = vsyncadd (%p1043_p1), [#allocation6], 4294965248  ;;  %v974_v0 = vmov 0.0   ;;  %v975_v1 = vmov 0   ;;  %v329_v2 = vld [vmem:[#allocation5 + $0x78] sm:$0xff]  ;;  %v328_v3 = vld [vmem:[#allocation5 + $0x70] sm:$0xff] }
  0x41   : > { %516 = vmatprep.mubr.f32.mxu1 %v974_v0  ;;  %407 = vmatprep.mubr.f32.mxu0 %v974_v0  ;;  %v327_v4 = vld [vmem:[#allocation5 + $0x68] sm:$0xff]  ;;  %p299_p8 = scmp.lt.s32.totalorder %s960_s21, 1  ;;  %v326_v5 = vld [vmem:[#allocation5 + $0x60] sm:$0xff]  ;;  %v325_v6 = vld [vmem:[#allocation5 + $0x58] sm:$0xff]  ;;  %vm447_vm0 = vcmask 1043456   ;;  %vm434_vm1 = vcmask 31744  }
  0x42   : > { %827 = vset.pattern.permute.xlu0 %v975_v1  ;;  %828 = vset.pattern.permute.xlu1 %v975_v1  ;;  %v324_v7 = vld [vmem:[#allocation5 + $0x50] sm:$0xff]  ;;  %v323_v8 = vld [vmem:[#allocation5 + $0x48] sm:$0xff]  ;;  %v322_v10 = vld [vmem:[#allocation5 + $0x40] sm:$0xff]  ;;  %vm330_vm2 = vcmask 523264   ;;  %s727_s11 = sshll.u32 %s1124_s16, 6  ;;  %s747_s14 = sshll.u32 %s960_s21, 10 }
  0x43   : > { %359 = vmatprep.subr.mxu0 %v329_v2  ;;  %v305_v9 = vld [vmem:[%s261_s10] sm:$0xff]  ;;  %s300_s1 = scalar_select %p299_p8, %s960_s21, 1  ;;  %v319_v15 = vld [vmem:[#allocation5 + $0x28] sm:$0xff]  ;;  %v318_v17 = vld [vmem:[#allocation5 + $0x20] sm:$0xff] }
  0x44   : > { %360 = vmatpush1.msra.mxu0 %v328_v3  ;;  %v433_v11 = vcombine.high %v305_v9, %v305_v9  ;;  %v321_v12 = vld [vmem:[#allocation5 + $0x38] sm:$0xff]  ;;  %v306_v13 = vld [vmem:[%s1256_s3] sm:$0xff]  ;;  %v543_v18 = vld [vmem:[%s1257_s4 + $0x10] sm:$0xff]  ;;  %s1188_s12 = scalar_lea.vmem [#allocation7], %s727_s11  ;;  %s1203_s15 = scalar_lea.hbm %s1258_s5, %s747_s14 }
  0x45   : > { %361 = vmatprep.subr.mxu0 %v327_v4  ;;  %v320_v14 = vld [vmem:[#allocation5 + $0x30] sm:$0xff]  ;;  %s746_s30 = sshll.u32 %s300_s1, 5  ;;  %v317_v19 = vld [vmem:[#allocation5 + $0x18] sm:$0xff]  ;;  %v315_v22 = vld [vmem:[#allocation5 + $0x8] sm:$0xff]  ;;  %557 = vperm.xlu1 %828, %v543_v18   ;;  %s605_s13 = sshll.u32 %s1188_s12, 4  ;;  %s1197_s13 = int_to_ptr.vmem [resolvable:$true] %s605_s13 }
  0x46   : > { %362 = vmatpush1.msra.mxu0 %v326_v5  ;;  %734 = vmatprep.subr.msk.mxu1 %vm447_vm0, %v433_v11  ;;  %v541_v16 = vld [vmem:[%s1257_s4] sm:$0xff]  ;;  %v307_v20 = vld [vmem:[%s1256_s3 + $0x8] sm:$0xff]  ;;  %s1157_s8 = scalar_lea.vmem %s1255_s2, %s746_s30  ;;  %v314_v24 = vld [vmem:[#allocation5] sm:$0xff]  ;;  %s884_s25 = scalar_lea.vmem %s1197_s13, 1024 }
  0x47   : > { %363 = vmatprep.subr.mxu0 %v325_v6  ;;  %735 = vmatpush1.msk.msra.mxu1 %vm447_vm0, %v305_v9  ;;  %v316_v21 = vld [vmem:[#allocation5 + $0x10] sm:$0xff]  ;;  %v542_v23 = vld [vmem:[%s1257_s4 + $0x8] sm:$0xff]  ;;  %v544_v25 = vld [vmem:[%s1257_s4 + $0x18] sm:$0xff]  ;;  %p885_p1 = scmp.ne.s32.totalorder %s1197_s13, %s884_s25  ;;  %s976_s21 = smov [#allocation7]  }
  0x48   : > { %364 = vmatpush1.msra.mxu0 %v324_v7  ;;  %736 = vmatmul.mubr.msk.f32.vlgmr.msra.gmra.mxu1 %vm434_vm1, %v306_v13  ;;  %v310_v26 = vld [vmem:[%s1157_s8] sm:$0xff]  ;;  %v308_v27 = vld [vmem:[%s1256_s3 + $0x10] sm:$0xff]  ;;  %v311_v28 = vld [vmem:[%s1157_s8 + $0x8] sm:$0xff]  ;;  %s888_s6 = sshll.u32 %s976_s21, 4  ;;  %s889_s6 = int_to_ptr.vmem [resolvable:$false] %s888_s6 }
  0x49   : > { %365 = vmatprep.subr.mxu0 %v323_v8  ;;  %522 = vmatprep.mubr.f32.mxu1 %v974_v0  ;;  %v309_v29 = vld [vmem:[%s1256_s3 + $0x18] sm:$0xff]  ;;  %v312_v30 = vld [vmem:[%s1157_s8 + $0x10] sm:$0xff]  ;;  %p886_p10 = pnand %p885_p1, %p1096_p13  ;;  %s890_s10 = scalar_lea.vmem %s889_s6, 2048 }
  0x4a   : > { %366 = vmatpush1.msra.mxu0 %v322_v10  ;;  %547 = vperm.xlu0 %827, %v541_v16   ;;  %v313_v31 = vld [vmem:[%s1157_s8 + $0x18] sm:$0xff]  ;;  %s590_s8 = scalar_lea.sflag [#allocation4], %s1124_s16  ;;  %p891_p2 = scmp.lt.s32.totalorder %s1197_s13, %s889_s6 }
  0x4b   : > { %367 = vmatprep.subr.mxu0 %v321_v12  ;;  %562 = vperm.xlu1 %828, %v544_v25   ;;  %p887_p0 = pneg %p886_p10  ;;  %p892_p3 = scmp.lt.s32.totalorder %s890_s10, %s884_s25 }
  0x4c   : > { %368 = vmatpush1.msra.mxu0 %v320_v14  ;;  %737 = vmatmul.mubr.msk.f32.gmra.mxu1 %vm434_vm1, %v307_v20 }
  0x4d   : > { %369 = vmatprep.subr.mxu0 %v319_v15  ;;  %528 = vmatprep.mubr.f32.mxu1 %v974_v0  ;;  %p893_p5 = por %p892_p3, %p891_p2 }
  0x4e   : > { %370 = vmatpush1.msra.mxu0 %v318_v17  ;;  %552 = vperm.xlu0 %827, %v542_v23  }
  0x4f   : > { %371 = vmatprep.subr.mxu0 %v317_v19  ;;  %p894_p7 = pnand %p893_p5, %p887_p0 }
  0x50   : > { %372 = vmatpush1.msra.mxu0 %v316_v21  ;;  %738 = vmatmul.mubr.msk.f32.gmra.mxu1 %vm434_vm1, %v308_v27 }
  0x51   : > { %373 = vmatprep.subr.mxu0 %v315_v22  ;;  %534 = vmatprep.mubr.f32.mxu1 %v974_v0 }
  0x52   : > { %374 = vmatpush1.msra.mxu0 %v314_v24 }
  0x53   : > { %730 = vmatmul.mubr.msk.f32.vlgmr.msra.gmra.mxu0 %vm330_vm2, %v310_v26 }
  0x54   : > { %413 = vmatprep.mubr.f32.mxu0 %v974_v0  ;;  %739 = vmatmul.mubr.msk.f32.gmra.mxu1 %vm434_vm1, %v309_v29 }
  0x57   : > { %731 = vmatmul.mubr.msk.f32.gmra.mxu0 %vm330_vm2, %v311_v28 }
  0x58   : > { %419 = vmatprep.mubr.f32.mxu0 %v974_v0 }
  0x5b   : > { %732 = vmatmul.mubr.msk.f32.gmra.mxu0 %vm330_vm2, %v312_v30 }
  0x5c   : > { %425 = vmatprep.mubr.f32.mxu0 %v974_v0 }
  0x5f   : > { %733 = vmatmul.mubr.msk.f32.gmra.mxu0 %vm330_vm2, %v313_v31 }
  0xc0   : > { %v558_v53 = vpop.permute.xlu1 %557 }
  0xc5   : > { %v548_v35 = vpop.permute.xlu0 %547 }
  0xc6   : > { %v563_v2 = vpop.permute.xlu1 %562 }
  0xc9   : > { %v553_v44 = vpop.permute.xlu0 %552 }
 0x108   : > { %v518_v32 = vpop.f32.mrf.mxu1 }
 0x10a   : > { %v520_v33 = vpop.f32.mrf.mxu1 }
 0x10c   : > { %v524_v34 = vpop.f32.mrf.mxu1 }
 0x10e   : > { %v526_v36 = vpop.f32.mrf.mxu1 }
 0x110   : > { %v530_v40 = vpop.f32.mrf.mxu1 }
 0x112   : > { %v532_v49 = vpop.f32.mrf.mxu1 }
 0x113   : > { %v409_v37 = vpop.f32.mrf.mxu0 }
 0x114   : > { %v519_v38 = vadd.f32 %v518_v32, %v409_v37  ;;  %v536_v59 = vpop.f32.mrf.mxu1 }
 0x115   : > { %v411_v39 = vpop.f32.mrf.mxu0 }
 0x116   : > { %v565_v41 = vadd.f32 %v548_v35, %v519_v38  ;;  %v521_v42 = vadd.f32 %v520_v33, %v411_v39  ;;  %v538_v4 = vpop.f32.mrf.mxu1 }
 0x117   : > { %v415_v43 = vpop.f32.mrf.mxu0 }
 0x118   : > { %v573_v45 = vmax.f32 %v565_v41, 0.0  ;;  %v566_v46 = vadd.f32 %v548_v35, %v521_v42  ;;  %v525_v47 = vadd.f32 %v524_v34, %v415_v43 }
 0x119   : > { %v417_v48 = vpop.f32.mrf.mxu0 }
 0x11a   : > { %581 = vst [vmem:[%s1188_s12] sm:$0xff] %v573_v45  ;;  %v574_v50 = vmax.f32 %v566_v46, 0.0  ;;  %v567_v51 = vadd.f32 %v553_v44, %v525_v47  ;;  %v527_v52 = vadd.f32 %v526_v36, %v417_v48 }
 0x11b   : > { %v421_v54 = vpop.f32.mrf.mxu0 }
 0x11c   : > { %582 = vst [vmem:[%s1188_s12 + $0x8] sm:$0xff] %v574_v50  ;;  %v575_v55 = vmax.f32 %v567_v51, 0.0  ;;  %v568_v56 = vadd.f32 %v553_v44, %v527_v52  ;;  %v531_v57 = vadd.f32 %v530_v40, %v421_v54 }
 0x11d   : > { %v423_v58 = vpop.f32.mrf.mxu0 }
 0x11e   : > { %583 = vst [vmem:[%s1188_s12 + $0x10] sm:$0xff] %v575_v55  ;;  %v576_v60 = vmax.f32 %v568_v56, 0.0  ;;  %v569_v61 = vadd.f32 %v558_v53, %v531_v57  ;;  %v533_v62 = vadd.f32 %v532_v49, %v423_v58 }
 0x11f   : > { %v427_v63 = vpop.f32.mrf.mxu0 }
 0x120   : > { %584 = vst [vmem:[%s1188_s12 + $0x18] sm:$0xff] %v576_v60  ;;  %v577_v0 = vmax.f32 %v569_v61, 0.0  ;;  %v570_v1 = vadd.f32 %v558_v53, %v533_v62  ;;  %v537_v3 = vadd.f32 %v536_v59, %v427_v63 }
 0x121   : > { %v429_v5 = vpop.f32.mrf.mxu0 }
 0x122   : > { %585 = vst [vmem:[%s1188_s12 + $0x20] sm:$0xff] %v577_v0  ;;  %v578_v6 = vmax.f32 %v570_v1, 0.0  ;;  %v571_v7 = vadd.f32 %v563_v2, %v537_v3  ;;  %v539_v8 = vadd.f32 %v538_v4, %v429_v5 }
 0x124   : > { %586 = vst [vmem:[%s1188_s12 + $0x28] sm:$0xff] %v578_v6  ;;  %v579_v9 = vmax.f32 %v571_v7, 0.0  ;;  %v572_v10 = vadd.f32 %v563_v2, %v539_v8 }
 0x126   : > { %587 = vst [vmem:[%s1188_s12 + $0x30] sm:$0xff] %v579_v9  ;;  %v580_v11 = vmax.f32 %v572_v10, 0.0 }
 0x128   : > { %588 = vst [vmem:[%s1188_s12 + $0x38] sm:$0xff] %v580_v11 }
 0x129   : > { %897 = shalt.err (!%p894_p7)
}
 0x12a   : > { %s898_s1 = scalar_lea.hbm %s1203_s15, 1024  ;;  %s902_s30 = scalar_lea.hbm %s1258_s5, 2048 }
 0x12b   : > { %p899_p6 = scmp.ne.s32.totalorder %s1203_s15, %s898_s1  ;;  %p903_p11 = scmp.lt.s32.totalorder %s1203_s15, %s1258_s5 }
 0x12c   : > { %p904_p12 = scmp.lt.s32.totalorder %s902_s30, %s898_s1 }
 0x12d   : > { %p900_p4 = pnand %p899_p6, %p1096_p13 }
 0x12e   : > { %p905_p8 = por %p904_p12, %p903_p11 }
 0x12f   : > { %p901_p9 = pneg %p900_p4 }
 0x131   : > { %p906_p1 = pnand %p905_p8, %p901_p9 }
 0x133   : > { %909 = shalt.err (!%p906_p1)
}
 0x134   : > { %s977_s12 = smov 256   ;;  %s978_s14 = smov 16  }
 0x135   : > { %754 = dma.vmem_to_hbm [thread:$0]  (%p1096_p13), %s1197_s13, 1024, %s1203_s15, %s590_s8, %s977_s12, %s977_s12, %s978_s14  }
 0x136 PF: > { %s620_s27 = sand.u32 1, %s948_s18   ;;  %p1274_p10 = scmp.ne.s32.totalorder %s1265_s29, 0 }
 0x137   : > { %p1275_p0 = scmp.ge.s32.totalorder %s968_s23, 2  ;;  %s621_s24 = scalar_lea.sflag [#allocation4], %s620_s27 }
 0x139   : > { %p765_p2 = pnand %p1275_p0, %p1274_p10 }
 0x13b   : > { %p766_p3 = pneg %p765_p2 }
 0x13d   : > { %943 = dma.done.wait (%p766_p3), %s621_s24, 1024  }
 0x13e   : > { %945 = vsyncadd (%p766_p3), %s621_s24, 4294966272  ;;  %s22_s23 = sadd.s32 1, %s968_s23   ;;  %s1276_s17 = sld [smem:[#allocation11_spill]] }
 0x13f   : > { %p19_p5 = scmp.ge.s32.totalorder %s22_s23, 4   ;;  %s1277_s18 = smov %s952_s19 }
 0x140   : > { %s1278_s19 = smov %s956_s20  ;;  %s1279_s20 = smov %s1105_s7 }
 0x141   : > { %s1280_s21 = smov %s964_s22  ;;  %21 = sbr.rel (!%p19_p5) target bundleno = 9 (0x9), region = 93 }
 0x144   : > { %s1281_s22 = smov %s1276_s17 }
 0x146   :  { %626 = vsyncpa [#allocation3], 1 }
 0x147   :  { %628 = vsyncpa [#allocation3 + $0x1], 1 }
 0x148   :  { %629 = vsyncpa [#allocation6], 1 }
 0x149   :  { %630 = vsyncpa [#allocation4], 1 }
 0x14a   :  { %632 = vsyncpa [#allocation4 + $0x1], 1 }

</bundles_post_ra>
